<compile_context>
chip_gen: v5e
topology: v5e:2x2
jax: 0.10.0
libtpu: 0.0.40
codegen_flags: <defaults>
</compile_context>

<pallas_src>
import functools

import jax
import jax.numpy as jnp
from jax.experimental import pallas as pl
from jax.experimental.pallas import tpu as pltpu


def _focal_ce_partial_kernel(x_ref, t_ref, partial_ref, m_sc, s_sc, tgt_sc,
                             *, n_rows, tile_n, tile_c, n_classes, mask_cols):
    """Streaming-LSE cross entropy; emits per-batch-tile partial CE sums.

    x_ref:       (tile_n, tile_c) logits block in VMEM (any float dtype).
    t_ref:       (tile_n, 1) int32 targets block.
    partial_ref: (1, 8, 128) f32 output slab (same block across the C axis);
                 wrapper reads element [0, 0].
    m_sc/s_sc/tgt_sc: (tile_n, 1) f32 scratch: running max, running sum-of-exp,
                 accumulated target logit.
    """
    i = pl.program_id(0)
    kc = pl.program_id(1)

    @pl.when(kc == 0)
    def _():
        m_sc[...] = jnp.full_like(m_sc, -jnp.inf)
        s_sc[...] = jnp.zeros_like(s_sc)
        tgt_sc[...] = jnp.zeros_like(tgt_sc)

    # bf16 is storage/transfer format only; all math in f32 (v5e has no bf16 VPU/EUP).
    x = x_ref[...].astype(jnp.float32)                              # (tile_n, tile_c)
    t = t_ref[...]                                                  # (tile_n, 1)

    # Global class index of each column in this C block (also used for gather).
    col = jax.lax.broadcasted_iota(jnp.int32, x.shape, 1) + kc * tile_c
    if mask_cols:
        # Only emitted when C % tile_c != 0: neutralize the ragged tail columns
        # so they never leak into valid rows' log-sum-exp.
        x = jnp.where(col < n_classes, x, -jnp.inf)

    # Online (streaming) log-sum-exp across the class-tile grid axis.
    m_prev = m_sc[...]
    m_new = jnp.maximum(m_prev, jnp.max(x, axis=-1, keepdims=True))
    s_sc[...] = (s_sc[...] * jnp.exp(m_prev - m_new)
                 + jnp.sum(jnp.exp(x - m_new), axis=-1, keepdims=True))
    m_sc[...] = m_new

    # Target-logit gather via compare+select (no dynamic gather on TPU).
    # Out-of-range targets match no column -> contribute 0 (documented above).
    tgt_sc[...] = tgt_sc[...] + jnp.sum(jnp.where(col == t, x, 0.0),
                                        axis=-1, keepdims=True)

    @pl.when(kc == pl.num_programs(1) - 1)
    def _():
        lse = jnp.log(s_sc[...]) + m_sc[...]                        # (tile_n, 1)
        ce = lse - tgt_sc[...]
        # Mask rows past the true batch size (ragged last N tile).  Padded-row
        # garbage is row-local (all reductions are axis=-1) and this select
        # yields an exact 0.0 even if ce is NaN/Inf, so no full-tile mask is
        # needed anywhere else.
        row = jax.lax.broadcasted_iota(jnp.int32, ce.shape, 0) + i * tile_n
        ce = jnp.where(row < n_rows, ce, 0.0)
        # Lane-dense (8, 128) partial slab per batch tile.
        partial_ref[...] = jnp.full(partial_ref.shape, jnp.sum(ce),
                                    dtype=jnp.float32)


def focal_loss(logits, target, alpha=0.5, gamma=2, max_tile_c=8192):
    """Pallas TPU implementation of FocalLoss.forward(input, target) -> scalar."""
    n, c = logits.shape
    t = target.astype(jnp.int32).reshape(n, 1)
    bytes_per_elt = jnp.dtype(logits.dtype).itemsize

    # ---- generation-aware VMEM limit & streamed-tile target -----------------
    # v5e/v6e: 128 MiB physical VMEM -> raise the scoped limit to 64 MiB and
    # stream ~6 MiB tiles.  v7x-class (64 MiB physical): keep the cap at 48 MiB
    # and ~4 MiB tiles, leaving pipeline headroom.
    try:
        vmem_cap = int(pltpu.get_tpu_info().vmem_capacity_bytes)
    except Exception:  # conservative fallback if the query is unavailable
        vmem_cap = 128 * 1024 * 1024
    if vmem_cap >= 100 * 1024 * 1024:
        vmem_limit = 64 * 1024 * 1024
        target_tile_bytes = 6 * 1024 * 1024
    else:
        vmem_limit = 48 * 1024 * 1024
        target_tile_bytes = 4 * 1024 * 1024

    # ---- class-axis tiling (streaming LSE) -----------------------------------
    # tile_c < C must be a multiple of 128 (lane constraint); tile_c == C is
    # always legal.  Large-C (ArcFace vocab) stays bounded in VMEM per block.
    if c <= max_tile_c:
        tile_c = c
    else:
        tile_c = (max_tile_c // 128) * 128
    num_c_tiles = pl.cdiv(c, tile_c)
    mask_cols = (c % tile_c) != 0

    # ---- batch-axis tiling ----------------------------------------------------
    # Budget the real working set: 2x double-buffered streamed tile plus ~5
    # f32-sized (tile_n, tile_c) temporaries (upcast, exp, iota, select, slack).
    per_row_bytes = 2 * tile_c * bytes_per_elt + 5 * tile_c * 4
    budget = max(per_row_bytes * 8, vmem_limit - 8 * 1024 * 1024)
    rows_from_budget = budget // per_row_bytes
    rows_from_stream = max(8, target_tile_bytes // max(1, tile_c * bytes_per_elt))
    if n <= 8:
        tile_n = n                      # block dim == full array dim is legal
    else:
        tile_n = int(min(n, rows_from_budget, rows_from_stream))
        tile_n = max(8, (tile_n // 8) * 8)   # (8, 128) sublane constraint
    num_n_tiles = pl.cdiv(n, tile_n)

    # Keep the batch grid even so v7x's two TensorCores stay balanced.
    if n > 8 and num_n_tiles > 1 and num_n_tiles % 2 == 1:
        cand = max(8, ((pl.cdiv(n, num_n_tiles + 1) + 7) // 8) * 8)
        if pl.cdiv(n, cand) % 2 == 0:
            tile_n = cand
            num_n_tiles = pl.cdiv(n, cand)

    cost = pl.CostEstimate(
        flops=int(6 * n * c),
        transcendentals=int(n * c),
        bytes_accessed=int(n * c * bytes_per_elt + n * 4
                           + num_n_tiles * 8 * 128 * 4),
    )

    kernel = functools.partial(
        _focal_ce_partial_kernel,
        n_rows=n, tile_n=tile_n, tile_c=tile_c, n_classes=c, mask_cols=mask_cols)

    partials = pl.pallas_call(
        kernel,
        out_shape=jax.ShapeDtypeStruct((num_n_tiles, 8, 128), jnp.float32),
        grid=(num_n_tiles, num_c_tiles),
        in_specs=[
            pl.BlockSpec((tile_n, tile_c), lambda i, kc: (i, kc)),  # logits stream
            pl.BlockSpec((tile_n, 1), lambda i, kc: (i, 0)),        # targets
        ],
        out_specs=pl.BlockSpec((1, 8, 128), lambda i, kc: (i, 0, 0)),
        scratch_shapes=[
            pltpu.VMEM((tile_n, 1), jnp.float32),   # running max
            pltpu.VMEM((tile_n, 1), jnp.float32),   # running sum of exp
            pltpu.VMEM((tile_n, 1), jnp.float32),   # accumulated target logit
        ],
        compiler_params=pltpu.CompilerParams(
            dimension_semantics=("parallel", "arbitrary"),
            vmem_limit_bytes=vmem_limit,
        ),
        cost_estimate=cost,
    )(logits, t)

    # Batch-mean CE, then focal weighting applied exactly once (as in the module).
    logp = jnp.sum(partials[:, 0, 0]) / jnp.float32(n)
    p = jnp.exp(-logp)
    return jnp.float32(alpha) * (1.0 - p) ** gamma * logp


def _reference_focal_loss(logits, target, alpha=0.5, gamma=2):
    logps = jax.nn.log_softmax(logits.astype(jnp.float32), axis=-1)
    ce = -jnp.take_along_axis(logps, target[:, None].astype(jnp.int32), axis=-1)
    logp = jnp.mean(ce)
    p = jnp.exp(-logp)
    return alpha * (1.0 - p) ** gamma * logp


if __name__ == "__main__":
    key = jax.random.PRNGKey(0)
    k1, k2, k3, k4, k5, k6, k7, k8 = jax.random.split(key, 8)

    # Case 1: small f32 batch, single tile.
    N1, C1 = 8, 32
    x1 = jax.random.normal(k1, (N1, C1), dtype=jnp.float32)
    t1 = jax.random.randint(k2, (N1,), 0, C1, dtype=jnp.int32)
    out1 = jax.block_until_ready(focal_loss(x1, t1, alpha=0.5, gamma=2))
    ref1 = _reference_focal_loss(x1, t1, alpha=0.5, gamma=2)
    assert jnp.allclose(out1, ref1, rtol=1e-5, atol=1e-5), (out1, ref1)

    # Case 2: ragged batch (multi-N-tile grid + row masking), bf16 logits
    # streamed without any wrapper-side f32 upcast.
    N2, C2 = 20, 48
    x2 = jax.random.normal(k3, (N2, C2), dtype=jnp.float32).astype(jnp.bfloat16)
    t2 = jax.random.randint(k4, (N2,), 0, C2, dtype=jnp.int32)
    out2 = jax.block_until_ready(focal_loss(x2, t2, alpha=0.5, gamma=2))
    ref2 = _reference_focal_loss(x2, t2, alpha=0.5, gamma=2)
    assert jnp.allclose(out2, ref2, rtol=1e-4, atol=1e-4), (out2, ref2)

    # Case 3: ragged class axis -> streaming log-sum-exp over 2 C-tiles with
    # the column mask path (C % tile_c != 0), bf16 storage.
    N3, C3 = 24, 200
    x3 = jax.random.normal(k5, (N3, C3), dtype=jnp.float32).astype(jnp.bfloat16)
    t3 = jax.random.randint(k6, (N3,), 0, C3, dtype=jnp.int32)
    out3 = jax.block_until_ready(focal_loss(x3, t3, alpha=0.5, gamma=2, max_tile_c=128))
    ref3 = _reference_focal_loss(x3, t3, alpha=0.5, gamma=2)
    assert jnp.allclose(out3, ref3, rtol=1e-4, atol=1e-4), (out3, ref3)

    # Case 4: multi-N-tile AND multi-C-tile (exact C split), f32.
    N4, C4 = 20, 384
    x4 = jax.random.normal(k7, (N4, C4), dtype=jnp.float32)
    t4 = jax.random.randint(k8, (N4,), 0, C4, dtype=jnp.int32)
    out4 = jax.block_until_ready(focal_loss(x4, t4, alpha=0.5, gamma=2, max_tile_c=128))
    ref4 = _reference_focal_loss(x4, t4, alpha=0.5, gamma=2)
    assert jnp.allclose(out4, ref4, rtol=1e-5, atol=1e-5), (out4, ref4)

    print("KERNEL_OK")
</pallas_src>

<mosaic_0001>
module attributes {stable_mosaic.version = 11 : i64} {
  func.func @_focal_ce_partial_kernel(%arg0: i32, %arg1: i32, %arg2: memref<8x32xf32, #tpu.memory_space<vmem>>, %arg3: memref<8x1xi32, #tpu.memory_space<vmem>>, %arg4: memref<1x8x128xf32, #tpu.memory_space<vmem>>, %arg5: memref<8x1xf32, #tpu.memory_space<vmem>>, %arg6: memref<8x1xf32, #tpu.memory_space<vmem>>, %arg7: memref<8x1xf32, #tpu.memory_space<vmem>>) attributes {dimension_semantics = [#tpu.dimension_semantics<parallel>, #tpu.dimension_semantics<arbitrary>], iteration_bounds = array<i64: 1, 1>, scalar_prefetch = 0 : i64, scratch_operands = 3 : i64, tpu.core_type = #tpu.core_type<tc>, window_params = [{transform_indices = @transform_0, window_bounds = array<i64: 8, 32>}, {transform_indices = @transform_1, window_bounds = array<i64: 8, 1>}, {transform_indices = @transform_2, window_bounds = array<i64: 1, 8, 128>}]} {
    %c0_i32 = arith.constant 0 : i32
    %0 = arith.cmpi eq, %arg1, %c0_i32 : i32
    %1 = arith.extui %0 : i1 to i32
    %c0_i32_0 = arith.constant 0 : i32
    %2 = arith.cmpi ne, %1, %c0_i32_0 : i32
    scf.if %2 {
      %cst_21 = arith.constant 0xFF800000 : f32
      %37 = vector.broadcast %cst_21 : f32 to vector<8x1xf32>
      %c0_22 = arith.constant 0 : index
      %c0_23 = arith.constant 0 : index
      %38 = vector.load %arg5[%c0_22, %c0_23] : memref<8x1xf32, #tpu.memory_space<vmem>>, vector<8x1xf32>
      tpu.vector_store %arg5[%c0_22, %c0_23], %37 {strides = array<i32>} : memref<8x1xf32, #tpu.memory_space<vmem>>, vector<8x1xf32>,
      %cst_24 = arith.constant 0.000000e+00 : f32
      %39 = vector.broadcast %cst_24 : f32 to vector<8x1xf32>
      %c0_25 = arith.constant 0 : index
      %c0_26 = arith.constant 0 : index
      %40 = vector.load %arg6[%c0_25, %c0_26] : memref<8x1xf32, #tpu.memory_space<vmem>>, vector<8x1xf32>
      tpu.vector_store %arg6[%c0_25, %c0_26], %39 {strides = array<i32>} : memref<8x1xf32, #tpu.memory_space<vmem>>, vector<8x1xf32>,
      %cst_27 = arith.constant 0.000000e+00 : f32
      %41 = vector.broadcast %cst_27 : f32 to vector<8x1xf32>
      %c0_28 = arith.constant 0 : index
      %c0_29 = arith.constant 0 : index
      %42 = vector.load %arg7[%c0_28, %c0_29] : memref<8x1xf32, #tpu.memory_space<vmem>>, vector<8x1xf32>
      tpu.vector_store %arg7[%c0_28, %c0_29], %41 {strides = array<i32>} : memref<8x1xf32, #tpu.memory_space<vmem>>, vector<8x1xf32>,
    } else {
    }
    %c0 = arith.constant 0 : index
    %c0_1 = arith.constant 0 : index
    %3 = vector.load %arg2[%c0, %c0_1] : memref<8x32xf32, #tpu.memory_space<vmem>>, vector<8x32xf32>
    %c0_2 = arith.constant 0 : index
    %c0_3 = arith.constant 0 : index
    %4 = vector.load %arg3[%c0_2, %c0_3] : memref<8x1xi32, #tpu.memory_space<vmem>>, vector<8x1xi32>
    %5 = tpu.iota {dimensions = array<i32: 1>} : vector<8x32xi32>
    %c32_i32 = arith.constant 32 : i32
    %6 = arith.muli %arg1, %c32_i32 : i32
    %7 = vector.broadcast %6 : i32 to vector<8x32xi32>
    %8 = arith.addi %5, %7 : vector<8x32xi32>
    %c0_4 = arith.constant 0 : index
    %c0_5 = arith.constant 0 : index
    %9 = vector.load %arg5[%c0_4, %c0_5] : memref<8x1xf32, #tpu.memory_space<vmem>>, vector<8x1xf32>
    %cst = arith.constant dense<0xFF800000> : vector<8xf32>
    %10 = vector.multi_reduction <maximumf>, %3, %cst [1] : vector<8x32xf32> to vector<8xf32>
    %11 = vector.shape_cast %10 : vector<8xf32> to vector<8x1xf32>
    %12 = arith.maximumf %9, %11 : vector<8x1xf32>
    %c0_6 = arith.constant 0 : index
    %c0_7 = arith.constant 0 : index
    %13 = vector.load %arg6[%c0_6, %c0_7] : memref<8x1xf32, #tpu.memory_space<vmem>>, vector<8x1xf32>
    %14 = arith.subf %9, %12 : vector<8x1xf32>
    %15 = math.exp %14 : vector<8x1xf32>
    %16 = arith.mulf %13, %15 : vector<8x1xf32>
    %17 = vector.broadcast %12 : vector<8x1xf32> to vector<8x32xf32>
    %18 = arith.subf %3, %17 : vector<8x32xf32>
    %19 = math.exp %18 : vector<8x32xf32>
    %cst_8 = arith.constant dense<0.000000e+00> : vector<8xf32>
    %20 = vector.multi_reduction <add>, %19, %cst_8 [1] : vector<8x32xf32> to vector<8xf32>
    %21 = vector.shape_cast %20 : vector<8xf32> to vector<8x1xf32>
    %22 = arith.addf %16, %21 : vector<8x1xf32>
    %c0_9 = arith.constant 0 : index
    %c0_10 = arith.constant 0 : index
    %23 = vector.load %arg6[%c0_9, %c0_10] : memref<8x1xf32, #tpu.memory_space<vmem>>, vector<8x1xf32>
    tpu.vector_store %arg6[%c0_9, %c0_10], %22 {strides = array<i32>} : memref<8x1xf32, #tpu.memory_space<vmem>>, vector<8x1xf32>,
    %c0_11 = arith.constant 0 : index
    %c0_12 = arith.constant 0 : index
    %24 = vector.load %arg5[%c0_11, %c0_12] : memref<8x1xf32, #tpu.memory_space<vmem>>, vector<8x1xf32>
    tpu.vector_store %arg5[%c0_11, %c0_12], %12 {strides = array<i32>} : memref<8x1xf32, #tpu.memory_space<vmem>>, vector<8x1xf32>,
    %c0_13 = arith.constant 0 : index
    %c0_14 = arith.constant 0 : index
    %25 = vector.load %arg7[%c0_13, %c0_14] : memref<8x1xf32, #tpu.memory_space<vmem>>, vector<8x1xf32>
    %26 = vector.broadcast %4 : vector<8x1xi32> to vector<8x32xi32>
    %27 = arith.cmpi eq, %8, %26 : vector<8x32xi32>
    %cst_15 = arith.constant 0.000000e+00 : f32
    %28 = vector.broadcast %cst_15 : f32 to vector<8x32xf32>
    %29 = arith.select %27, %3, %28 : vector<8x32xi1>, vector<8x32xf32>
    %cst_16 = arith.constant dense<0.000000e+00> : vector<8xf32>
    %30 = vector.multi_reduction <add>, %29, %cst_16 [1] : vector<8x32xf32> to vector<8xf32>
    %31 = vector.shape_cast %30 : vector<8xf32> to vector<8x1xf32>
    %32 = arith.addf %25, %31 : vector<8x1xf32>
    %c0_17 = arith.constant 0 : index
    %c0_18 = arith.constant 0 : index
    %33 = vector.load %arg7[%c0_17, %c0_18] : memref<8x1xf32, #tpu.memory_space<vmem>>, vector<8x1xf32>
    tpu.vector_store %arg7[%c0_17, %c0_18], %32 {strides = array<i32>} : memref<8x1xf32, #tpu.memory_space<vmem>>, vector<8x1xf32>,
    %c0_i32_19 = arith.constant 0 : i32
    %34 = arith.cmpi eq, %arg1, %c0_i32_19 : i32
    %35 = arith.extui %34 : i1 to i32
    %c0_i32_20 = arith.constant 0 : i32
    %36 = arith.cmpi ne, %35, %c0_i32_20 : i32
    scf.if %36 {
      %c0_21 = arith.constant 0 : index
      %c0_22 = arith.constant 0 : index
      %37 = vector.load %arg6[%c0_21, %c0_22] : memref<8x1xf32, #tpu.memory_space<vmem>>, vector<8x1xf32>
      %38 = math.log %37 : vector<8x1xf32>
      %c0_23 = arith.constant 0 : index
      %c0_24 = arith.constant 0 : index
      %39 = vector.load %arg5[%c0_23, %c0_24] : memref<8x1xf32, #tpu.memory_space<vmem>>, vector<8x1xf32>
      %40 = arith.addf %38, %39 : vector<8x1xf32>
      %c0_25 = arith.constant 0 : index
      %c0_26 = arith.constant 0 : index
      %41 = vector.load %arg7[%c0_25, %c0_26] : memref<8x1xf32, #tpu.memory_space<vmem>>, vector<8x1xf32>
      %42 = arith.subf %40, %41 : vector<8x1xf32>
      %43 = tpu.iota {dimensions = array<i32: 0>} : vector<8x1xi32>
      %c8_i32 = arith.constant 8 : i32
      %44 = arith.muli %arg0, %c8_i32 : i32
      %45 = vector.broadcast %44 : i32 to vector<8x1xi32>
      %46 = arith.addi %43, %45 : vector<8x1xi32>
      %c8_i32_27 = arith.constant 8 : i32
      %47 = vector.broadcast %c8_i32_27 : i32 to vector<8x1xi32>
      %48 = arith.cmpi slt, %46, %47 : vector<8x1xi32>
      %cst_28 = arith.constant 0.000000e+00 : f32
      %49 = vector.broadcast %cst_28 : f32 to vector<8x1xf32>
      %50 = arith.select %48, %42, %49 : vector<8x1xi1>, vector<8x1xf32>
      %51 = vector.shape_cast %50 : vector<8x1xf32> to vector<1x8x1xf32>
      %cst_29 = arith.constant dense<0.000000e+00> : vector<1xf32>
      %52 = vector.multi_reduction <add>, %51, %cst_29 [1, 2] : vector<1x8x1xf32> to vector<1xf32>
      %53 = vector.shape_cast %52 : vector<1xf32> to vector<1x1x1xf32>
      %54 = vector.extract %53[0, 0, 0] : f32 from vector<1x1x1xf32>
      %55 = vector.broadcast %54 : f32 to vector<1x8x128xf32>
      %c0_30 = arith.constant 0 : index
      %c0_31 = arith.constant 0 : index
      %c0_32 = arith.constant 0 : index
      %56 = vector.load %arg4[%c0_30, %c0_31, %c0_32] : memref<1x8x128xf32, #tpu.memory_space<vmem>>, vector<1x8x128xf32>
      tpu.vector_store %arg4[%c0_30, %c0_31, %c0_32], %55 {strides = array<i32>} : memref<1x8x128xf32, #tpu.memory_space<vmem>>, vector<1x8x128xf32>,
    } else {
    }
    return
  }
  func.func @transform_0(%arg0: i32, %arg1: i32) -> (i32, i32) {
    %c0_i32 = arith.constant 0 : i32
    return %arg0, %arg1 : i32, i32
  }
  func.func @transform_1(%arg0: i32, %arg1: i32) -> (i32, i32) {
    %c0_i32 = arith.constant 0 : i32
    %c0_i32_0 = arith.constant 0 : i32
    return %arg0, %c0_i32 : i32, i32
  }
  func.func @transform_2(%arg0: i32, %arg1: i32) -> (i32, i32, i32) {
    %c0_i32 = arith.constant 0 : i32
    %c0_i32_0 = arith.constant 0 : i32
    %c0_i32_1 = arith.constant 0 : i32
    return %arg0, %c0_i32, %c0_i32_0 : i32, i32, i32
  }
}

</mosaic_0001>

<bundles_post_ra>
// kernel: tpu_custom_call.1
= control target key start
LH: loop header
LB: loop body
LE: loop exit
PB: predicated region body
PF: predicated region fallthrough
CT: control target
= control target key end

     0   :  { %vm28_vm0 = vcmask 261120   ;;  %s187_s0 = inlined_call_operand.vmem [shape: f32[8,32], index: 0, kind: input, shape index: {}]   ;;  %s188_s1 = inlined_call_operand.vmem [shape: s32[8,1], index: 1, kind: input, shape index: {}]   ;;  %s189_s2 = inlined_call_operand.hbm [shape: f32[1,8,128], index: 2, kind: output, shape index: {}]  }
   0x1   :  { %v20_v0 = vld [vmem:[%s187_s0] sm:$0xff] }
   0x2   :  { %7 = vsyncpa [#allocation6], 0  ;;  %v29_v1 = vsel %vm28_vm0, %v20_v0, -inf  ;;  %vm16_vm1 = vcmask 7168   ;;  %v149_v2 = vmov -inf   ;;  %v150_v3 = vmov 0  }
   0x3   :  { %30 = vmax.xlane.f32.xlu0 %v29_v1  ;;  %17 = vst.msk [vmem:[#allocation2] sm:$0xff] %vm16_vm1, %v149_v2  ;;  %116 = vset.pattern.permute.xlu1 %v150_v3  ;;  %v151_v4 = vmov 0.0   ;;  %v21_v5 = vld [vmem:[%s188_s1] sm:$0xff]  ;;  %v22_v10 = vlaneseq  ;;  %s152_s0 = smov [#allocation5]   ;;  %s100_s15 = sshll.u32 %s189_s2, 4  ;;  %s101_s15 = int_to_ptr.hbm [resolvable:$true] %s100_s15 }
   0x4   :  { %115 = vset.pattern.permute.xlu0 %v150_v3  ;;  %18 = vst.msk [vmem:[#allocation3] sm:$0xff] %vm16_vm1, %v151_v4  ;;  %55 = vperm.xlu1 %116, %v21_v5   ;;  %s98_s1 = sshll.u32 %s152_s0, 4  ;;  %s99_s1 = int_to_ptr.vmem [resolvable:$true] %s98_s1 }
   0x5   :  { %19 = vst.msk [vmem:[#allocation4] sm:$0xff] %vm16_vm1, %v151_v4  ;;  %v23_v12 = vand.u32 127, %v22_v10 }
   0xa   :  { %v27_v6 = vld [vmem:[#allocation2] sm:$0xff] }
   0xb   :  { %v33_v25 = vld [vmem:[#allocation3] sm:$0xff] }
   0xc   :  { %v53_v20 = vld [vmem:[#allocation4] sm:$0xff] }
  0x76   :  { %v31_v7 = vpop.xlane.xlu0 %30  ;;  %v56_v11 = vpop.permute.xlu1 %55 }
  0x77   :  { %v32_v8 = vmax.f32 %v27_v6, %v31_v7  ;;  %vm57_vm2 = vcmp.eq.s32.totalorder %v23_v12, %v56_v11 }
  0x78   :  { %v58_v13 = vsel %vm57_vm2, %v20_v0, 0.0 }
  0x79   :  { %v34_v9 = vsub.f32 %v27_v6, %v32_v8  ;;  %52 = vst.msk [vmem:[#allocation2] sm:$0xff] %vm16_vm1, %v32_v8  ;;  %40 = vperm.xlu0 %115, %v32_v8   ;;  %v59_v14 = vsel %vm28_vm0, %v58_v13, 0.0 }
  0x7a   :  { %60 = vadd.xlane.f32.xlu2 %v59_v14 }
  0x7b   :  { %v35_v23 = vmul.f32 1.442695, %v34_v9 }
  0x80   :  { %v70_v32 = vld [vmem:[#allocation2] sm:$0xff] }
  0xeb   :  { %v41_v15 = vpop.permute.xlu0 %40 }
  0xec   :  { %v43_v16 = vsub.f32 %v20_v0, %v41_v15 }
  0xed   :  { %v61_v21 = vpop.xlane.xlu2 %60 }
  0xee   :  { %v44_v17 = vmul.f32 1.442695, %v43_v16  ;;  %v62_v22 = vadd.f32 %v61_v21, %v53_v20 }
  0xf0   :  { %117 = vpow2.f32 %v44_v17  ;;  %63 = vst.msk [vmem:[#allocation4] sm:$0xff] %vm16_vm1, %v62_v22 }
  0xf1   :  { %119 = vpow2.f32 %v35_v23 }
  0xf6   :  { %v118_v18 = vpop.eup %117 }
  0xf7   :  { %v46_v19 = vsel %vm28_vm0, %v118_v18, 0.0  ;;  %v120_v24 = vpop.eup %119  ;;  %v72_v33 = vld [vmem:[#allocation4] sm:$0xff] }
  0xf8   :  { %47 = vadd.xlane.f32.xlu1 %v46_v19  ;;  %v37_v26 = vmul.f32 %v120_v24, %v33_v25 }
 0x16b   :  { %v48_v27 = vpop.xlane.xlu1 %47 }
 0x16c   :  { %v49_v28 = vadd.f32 %v48_v27, %v37_v26 }
 0x16e   :  { %51 = vst.msk [vmem:[#allocation3] sm:$0xff] %vm16_vm1, %v49_v28 }
 0x175   :  { %v67_v29 = vld [vmem:[#allocation3] sm:$0xff] }
 0x176   :  { %121 = vlog2.f32 %v67_v29 }
 0x17c   :  { %v122_v30 = vpop.eup %121 }
 0x17d   :  { %v69_v31 = vmul.f32 0.6931472, %v122_v30 }
 0x17f   :  { %v71_v34 = vadd.f32 %v70_v32, %v69_v31 }
 0x181   :  { %v73_v35 = vsub.f32 %v71_v34, %v72_v33 }
 0x183   :  { %v81_v36 = vsel %vm16_vm1, %v73_v35, 0.0 }
 0x184   :  { %82 = vadd.xlane.f32.xlu2 %v81_v36 }
 0x1f7   :  { %v83_v37 = vpop.xlane.xlu2 %82 }
 0x1f8   :  { %v84_v38 = vrot.slane %v83_v37, 4 }
 0x1fa   :  { %v85_v39 = vadd.f32 %v84_v38, %v83_v37 }
 0x1fc   :  { %v86_v40 = vrot.slane %v85_v39, 2 }
 0x1fe   :  { %v87_v41 = vadd.f32 %v86_v40, %v85_v39 }
 0x200   :  { %v88_v42 = vrot.slane %v87_v41, 1 }
 0x202   :  { %v89_v43 = vadd.f32 %v88_v42, %v87_v41 }
 0x204   :  { %109 = vpush %v89_v43 }
 0x235   :  { %s110_s16 = spop %109 }
 0x236   :  { %v91_v44 = vstv %s110_s16 }
 0x237   :  { %92 = vst [vmem:[#allocation5] sm:$0xff] %v91_v44 }
 0x238   :  { %103 = dma.vmem_to_hbm [thread:$0]  %s99_s1, 128, %s101_s15, [#allocation6]  }
 0x239   :  { %147 = dma.done.wait [#allocation6], 128  }
 0x23a   :  { %148 = vsyncadd [#allocation6], 4294967168 }
 0x23b   :  { %108 = vsyncpa [#allocation6], 1 }

</bundles_post_ra>
